<compile_context>
chip_gen: v6e
topology: v6e:2x2x1
jax: 0.10.0
libtpu: 0.0.40
codegen_flags: <defaults>
</compile_context>

<pallas_src>
import functools

import jax
import jax.numpy as jnp
from jax import lax
from jax.experimental import pallas as pl
from jax.experimental.pallas import tpu as pltpu

_VMEM_LIMIT = 64 * 1024 * 1024


def _round_up(v, m):
    return ((v + m - 1) // m) * m


# ----------------------------------------------------------------------------
# Kernel 1: feature-extractor tail (pooled @ fe_w) + hoisted GRU input gates
# ----------------------------------------------------------------------------
def _feat_gi_kernel(x_ref, fw_ref, fb_ref, wih_ref, bih_ref, feat_ref, gi_ref):
    # x_ref:  (rb, C)  bf16 (pooled rows)      fw_ref:  (C, F)  bf16
    # fb_ref: (1, F)   f32                     wih_ref: (F, 3H) bf16 (gates r|z|n)
    # bih_ref:(1, 3H)  f32
    # feat_ref:(rb, F) bf16                    gi_ref:  (rb, 3H) bf16
    feat = (
        jnp.dot(x_ref[...], fw_ref[...], preferred_element_type=jnp.float32)
        + fb_ref[...]
    )
    feat_ref[...] = feat.astype(feat_ref.dtype)
    # single fused gate matmul (one MXU push instead of three)
    gi = (
        jnp.dot(feat.astype(jnp.bfloat16), wih_ref[...],
                preferred_element_type=jnp.float32)
        + bih_ref[...]
    )
    gi_ref[...] = gi.astype(gi_ref.dtype)


def feature_and_gates(rows, fw, fb, wih, bih, *, row_block=256):
    # rows: (R, C) bf16, R is already a multiple of 16 (caller pads N to 16).
    assert row_block % 16 == 0
    R, C = rows.shape
    F = fw.shape[1]
    G = wih.shape[1]  # 3H
    rb = R if R <= row_block else row_block
    Rp = _round_up(R, rb)
    if Rp != R:
        rows = jnp.pad(rows, ((0, Rp - R), (0, 0)))

    feat, gi = pl.pallas_call(
        _feat_gi_kernel,
        out_shape=(
            jax.ShapeDtypeStruct((Rp, F), jnp.bfloat16),
            jax.ShapeDtypeStruct((Rp, G), jnp.bfloat16),
        ),
        grid=(Rp // rb,),
        in_specs=[
            pl.BlockSpec((rb, C), lambda i: (i, 0)),
            pl.BlockSpec((C, F), lambda i: (0, 0)),
            pl.BlockSpec((1, F), lambda i: (0, 0)),
            pl.BlockSpec((F, G), lambda i: (0, 0)),
            pl.BlockSpec((1, G), lambda i: (0, 0)),
        ],
        out_specs=(
            pl.BlockSpec((rb, F), lambda i: (i, 0)),
            pl.BlockSpec((rb, G), lambda i: (i, 0)),
        ),
        compiler_params=pltpu.CompilerParams(
            dimension_semantics=("parallel",),
            vmem_limit_bytes=_VMEM_LIMIT,
        ),
    )(rows, fw, fb, wih, bih)

    if Rp != R:
        feat, gi = feat[:R], gi[:R]
    return feat, gi


# ----------------------------------------------------------------------------
# Kernel 2: GRU recurrence (Tb steps per grid step) + batched theta head
# ----------------------------------------------------------------------------
def _gru_head_kernel(*refs, tb, hidden, use_residual, unroll):
    if use_residual:
        (gi_ref, feat_ref, whh_ref, bhh_ref, decw_ref, decb_ref,
         theta_ref, h_ref, y_ref) = refs
    else:
        (gi_ref, whh_ref, bhh_ref, decw_ref, decb_ref,
         theta_ref, h_ref, y_ref) = refs
        feat_ref = None

    # gi_ref:   (Tb, Nb, 3H) bf16   feat_ref: (Tb, Nb, F) bf16 (residual only)
    # whh_ref:  (H, 3H) bf16        bhh_ref:  (1, 3H) f32
    # decw_ref: (F, P) bf16         decb_ref: (1, P) f32
    # theta_ref:(Tb, Nb, P) f32
    # h_ref:    (Nb, H) f32 scratch (carried across the time grid axis)
    # y_ref:    (Tb, Nb, F) bf16 scratch (per-block GRU outputs)
    @pl.when(pl.program_id(1) == 0)
    def _():
        h_ref[...] = jnp.zeros_like(h_ref)

    H = hidden

    def step(t, carry):
        h = h_ref[...]
        # one fused (Nb, H) @ (H, 3H) recurrence matmul per step
        gh = (
            jnp.dot(h.astype(jnp.bfloat16), whh_ref[...],
                    preferred_element_type=jnp.float32)
            + bhh_ref[...]
        )
        gi = gi_ref[t].astype(jnp.float32)
        r = jax.nn.sigmoid(gi[:, :H] + gh[:, :H])
        z = jax.nn.sigmoid(gi[:, H:2 * H] + gh[:, H:2 * H])
        n = jnp.tanh(gi[:, 2 * H:] + r * gh[:, 2 * H:])
        h_new = (1.0 - z) * n + z * h
        h_ref[...] = h_new
        if use_residual:
            y = h_new + feat_ref[t].astype(jnp.float32)
        else:
            y = h_new
        y_ref[t] = y.astype(y_ref.dtype)
        return carry

    lax.fori_loop(0, tb, step, 0, unroll=unroll)

    # hoisted theta head: one (Tb*Nb, F) @ (F, P) matmul per grid step
    nb = y_ref.shape[1]
    d = y_ref.shape[2]
    p = decw_ref.shape[1]
    y_all = y_ref[...].reshape(tb * nb, d)
    theta = (
        jnp.dot(y_all, decw_ref[...], preferred_element_type=jnp.float32)
        + decb_ref[...]
    )
    theta_ref[...] = theta.reshape(tb, nb, p)


def gru_regressor(gi, feat, whh, bhh, dec_w, dec_b, *,
                  use_residual, time_block, batch_block):
    Tp, Np, G = gi.shape
    H = whh.shape[0]
    Dy = dec_w.shape[0]
    P = dec_w.shape[1]
    Tb, Nb = time_block, batch_block
    assert Tp % Tb == 0 and Np % Nb == 0 and Nb % 16 == 0

    kernel = functools.partial(
        _gru_head_kernel, tb=Tb, hidden=H,
        use_residual=use_residual, unroll=bool(Tb <= 8))

    in_specs = [pl.BlockSpec((Tb, Nb, G), lambda b, s: (s, b, 0))]
    operands = [gi]
    if use_residual:
        in_specs.append(pl.BlockSpec((Tb, Nb, feat.shape[-1]),
                                     lambda b, s: (s, b, 0)))
        operands.append(feat)
    # NOTE(real scale, v7x): add pipeline_mode=pl.Buffered(1) to these four
    # grid-invariant weight specs to avoid double-buffering the 24 MiB whh.
    in_specs += [
        pl.BlockSpec((H, G), lambda b, s: (0, 0)),
        pl.BlockSpec((1, G), lambda b, s: (0, 0)),
        pl.BlockSpec((Dy, P), lambda b, s: (0, 0)),
        pl.BlockSpec((1, P), lambda b, s: (0, 0)),
    ]
    operands += [whh, bhh, dec_w, dec_b]

    return pl.pallas_call(
        kernel,
        out_shape=jax.ShapeDtypeStruct((Tp, Np, P), jnp.float32),
        grid=(Np // Nb, Tp // Tb),
        in_specs=in_specs,
        out_specs=pl.BlockSpec((Tb, Nb, P), lambda b, s: (s, b, 0)),
        scratch_shapes=[
            pltpu.VMEM((Nb, H), jnp.float32),       # carried hidden state
            pltpu.VMEM((Tb, Nb, Dy), jnp.bfloat16),  # per-block GRU outputs
        ],
        compiler_params=pltpu.CompilerParams(
            dimension_semantics=("parallel", "arbitrary"),
            vmem_limit_bytes=_VMEM_LIMIT,
        ),
    )(*operands)


# ----------------------------------------------------------------------------
# One-time weight repacking (hoisted out of the forward)
# ----------------------------------------------------------------------------
def prepare_params(params, *, theta_dim=85):
    F = params["fe_w"].shape[1]
    H = params["w_hh"].shape[1]
    P = _round_up(theta_dim, 128)      # lane-dense (128-padded) theta head
    return {
        "F": F, "H": H, "P": P, "theta_dim": theta_dim,
        "fw": params["fe_w"].astype(jnp.bfloat16),                    # (C, F)
        "fb": params["fe_b"].reshape(1, F).astype(jnp.float32),
        "wih": params["w_ih"].T.astype(jnp.bfloat16),                 # (F, 3H)
        "bih": params["b_ih"].reshape(1, 3 * H).astype(jnp.float32),
        "whh": params["w_hh"].T.astype(jnp.bfloat16),                 # (H, 3H)
        "bhh": params["b_hh"].reshape(1, 3 * H).astype(jnp.float32),
        "dec_w": jnp.pad(params["dec_w"],
                         ((0, 0), (0, P - theta_dim))).astype(jnp.bfloat16),
        "dec_b": jnp.pad(params["dec_b"].reshape(1, theta_dim),
                         ((0, 0), (0, P - theta_dim))).astype(jnp.float32),
    }


# ----------------------------------------------------------------------------
# Full VibeRT forward (scaled)
# ----------------------------------------------------------------------------
def vibe_rt_forward(x, prepped, *, use_residual=True,
                    row_block=256, time_block=8, batch_block=None):
    # x: (N, T, C, H, W)
    N, T, C, Hi, Wi = x.shape
    F, H, P = prepped["F"], prepped["H"], prepped["P"]
    theta_dim = prepped["theta_dim"]
    apply_residual = bool(use_residual and H == F)

    # hmr.feature_extractor stand-in, part 1: global average pool (XLA mean,
    # un-folded from the weight), then time-major layout for the recurrence.
    pooled = x.reshape(N, T, C, Hi * Wi).mean(axis=-1)     # (N, T, C) f32
    pooled = pooled.transpose(1, 0, 2)                      # (T, N, C)

    # tiling / zero padding (GRU is causal: padded trailing timesteps and
    # padded batch rows never influence the real outputs).
    Tb = time_block if time_block <= T else T
    Nb = batch_block if batch_block is not None else N
    Nb = _round_up(Nb, 16)                 # bf16 sublane-tile alignment
    Np = _round_up(N, Nb)
    Tp = _round_up(T, Tb)
    pooled = jnp.pad(pooled, ((0, Tp - T), (0, Np - N), (0, 0)))

    rows = pooled.reshape(Tp * Np, C).astype(jnp.bfloat16)

    # Kernel 1: feature tail + hoisted GRU input gates (bf16 HBM intermediates)
    feat, gi = feature_and_gates(rows, prepped["fw"], prepped["fb"],
                                 prepped["wih"], prepped["bih"],
                                 row_block=row_block)
    feat_tm = feat.reshape(Tp, Np, F)
    gi_tm = gi.reshape(Tp, Np, 3 * H)

    # Kernel 2: GRU recurrence + residual + batched theta head
    theta_tm = gru_regressor(
        gi_tm, feat_tm if apply_residual else None,
        prepped["whh"], prepped["bhh"], prepped["dec_w"], prepped["dec_b"],
        use_residual=apply_residual, time_block=Tb, batch_block=Nb)

    theta = theta_tm[:T, :N, :theta_dim].transpose(1, 0, 2)   # (N, T, theta)
    # TODO(synk): verts / kp_2d / kp_3d / rotmat require the SMPL body model.
    return [{"theta": theta}]


# ----------------------------------------------------------------------------
# Pure-JAX references
#   emulate_bf16=True mirrors every bf16 storage/operand cast the kernels make
#   (tight impl check); emulate_bf16=False is plain f32 PyTorch semantics.
# ----------------------------------------------------------------------------
def _reference_forward(x, params, *, emulate_bf16):
    N, T, C, Hi, Wi = x.shape
    F = params["fe_w"].shape[1]
    H = params["w_hh"].shape[1]

    def q(a):
        return a.astype(jnp.bfloat16).astype(jnp.float32) if emulate_bf16 else a

    pooled = x.reshape(N, T, C, Hi * Wi).mean(axis=-1)                 # (N,T,C)
    feat = q(pooled) @ q(params["fe_w"]) + params["fe_b"][0]           # (N,T,F)
    feat_s = q(feat)                                                   # stored
    gi = q(feat) @ q(params["w_ih"]).T + params["b_ih"]                # (N,T,3H)
    gi_s = q(gi)                                                       # stored
    w_hh = q(params["w_hh"])

    h = jnp.zeros((N, H), jnp.float32)
    ys = []
    for t in range(T):
        gh = q(h) @ w_hh.T + params["b_hh"]
        g = gi_s[:, t]
        r = jax.nn.sigmoid(g[:, :H] + gh[:, :H])
        z = jax.nn.sigmoid(g[:, H:2 * H] + gh[:, H:2 * H])
        n = jnp.tanh(g[:, 2 * H:] + r * gh[:, 2 * H:])
        h = (1.0 - z) * n + z * h
        y = h + feat_s[:, t] if H == F else h
        ys.append(y)
    y = jnp.stack(ys, axis=1)                                          # (N,T,H)
    theta = q(y) @ q(params["dec_w"]) + params["dec_b"][0]
    return theta


def init_params(key, C, F, theta_dim=85):
    ks = jax.random.split(key, 8)
    s = 0.05
    return {
        "fe_w": s * jax.random.normal(ks[0], (C, F), jnp.float32),
        "fe_b": s * jax.random.normal(ks[1], (1, F), jnp.float32),
        "w_ih": s * jax.random.normal(ks[2], (3 * F, F), jnp.float32),  # PyTorch layout
        "w_hh": s * jax.random.normal(ks[3], (3 * F, F), jnp.float32),
        "b_ih": s * jax.random.normal(ks[4], (3 * F,), jnp.float32),
        "b_hh": s * jax.random.normal(ks[5], (3 * F,), jnp.float32),
        "dec_w": s * jax.random.normal(ks[6], (F, theta_dim), jnp.float32),
        "dec_b": s * jax.random.normal(ks[7], (1, theta_dim), jnp.float32),
    }


if __name__ == "__main__":
    # small shapes: batch=2, seqlen=16, channels=4, spatial=16x16, feature/hidden=32
    # (seqlen=16 with time_block=8 exercises the hidden-state carry across grid steps)
    N, T, C, Hi, Wi = 2, 16, 4, 16, 16
    F = 32

    key = jax.random.PRNGKey(0)
    k_in, k_p = jax.random.split(key)
    x = jax.random.normal(k_in, (N, T, C, Hi, Wi), jnp.float32)
    params = init_params(k_p, C, F)
    prepped = prepare_params(params)          # one-time weight repacking

    out = vibe_rt_forward(x, prepped, time_block=8, row_block=256)
    theta = out[0]["theta"]
    jax.block_until_ready(theta)

    ref_bf16 = _reference_forward(x, params, emulate_bf16=True)
    ref_f32 = _reference_forward(x, params, emulate_bf16=False)

    assert theta.shape == (N, T, 85)
    assert jnp.allclose(theta, ref_bf16, rtol=2e-3, atol=2e-3)   # impl check
    assert jnp.allclose(theta, ref_f32, rtol=3e-2, atol=3e-2)    # f32 semantics

    print("KERNEL_OK")
</pallas_src>

<mosaic_0001>
module attributes {stable_mosaic.version = 11 : i64} {
  func.func @_feat_gi_kernel(%arg0: i32, %arg1: memref<256x4xbf16, #tpu.memory_space<vmem>>, %arg2: memref<4x32xbf16, #tpu.memory_space<vmem>>, %arg3: memref<1x32xf32, #tpu.memory_space<vmem>>, %arg4: memref<32x96xbf16, #tpu.memory_space<vmem>>, %arg5: memref<1x96xf32, #tpu.memory_space<vmem>>, %arg6: memref<256x32xbf16, #tpu.memory_space<vmem>>, %arg7: memref<256x96xbf16, #tpu.memory_space<vmem>>) attributes {dimension_semantics = [#tpu.dimension_semantics<parallel>], iteration_bounds = array<i64: 1>, scalar_prefetch = 0 : i64, scratch_operands = 0 : i64, tpu.core_type = #tpu.core_type<tc>, window_params = [{transform_indices = @transform_0, window_bounds = array<i64: 256, 4>}, {pipeline_mode = #tpu.pipeline_mode<synchronous>, transform_indices = @transform_1, window_bounds = array<i64: 4, 32>}, {pipeline_mode = #tpu.pipeline_mode<synchronous>, transform_indices = @transform_2, window_bounds = array<i64: 1, 32>}, {pipeline_mode = #tpu.pipeline_mode<synchronous>, transform_indices = @transform_3, window_bounds = array<i64: 32, 96>}, {pipeline_mode = #tpu.pipeline_mode<synchronous>, transform_indices = @transform_4, window_bounds = array<i64: 1, 96>}, {transform_indices = @transform_5, window_bounds = array<i64: 256, 32>}, {transform_indices = @transform_6, window_bounds = array<i64: 256, 96>}]} {
    %c0 = arith.constant 0 : index
    %c0_0 = arith.constant 0 : index
    %0 = vector.load %arg1[%c0, %c0_0] : memref<256x4xbf16, #tpu.memory_space<vmem>>, vector<256x4xbf16>
    %c0_1 = arith.constant 0 : index
    %c0_2 = arith.constant 0 : index
    %1 = vector.load %arg2[%c0_1, %c0_2] : memref<4x32xbf16, #tpu.memory_space<vmem>>, vector<4x32xbf16>
    %cst = arith.constant dense<0.000000e+00> : vector<256x32xf32>
    %2 = tpu.matmul %0, %1, %cst {dimension_numbers = #tpu.dot_dimension_numbers<[1], [0], [0], [1], [0, 0, 1, 1], [], []>} : vector<256x4xbf16>, vector<4x32xbf16>, vector<256x32xf32> -> vector<256x32xf32>
    %c0_3 = arith.constant 0 : index
    %c0_4 = arith.constant 0 : index
    %3 = vector.load %arg3[%c0_3, %c0_4] : memref<1x32xf32, #tpu.memory_space<vmem>>, vector<1x32xf32>
    %4 = vector.broadcast %3 : vector<1x32xf32> to vector<256x32xf32>
    %5 = arith.addf %2, %4 : vector<256x32xf32>
    %6 = arith.truncf %5 : vector<256x32xf32> to vector<256x32xbf16>
    %c0_5 = arith.constant 0 : index
    %c0_6 = arith.constant 0 : index
    %7 = vector.load %arg6[%c0_5, %c0_6] : memref<256x32xbf16, #tpu.memory_space<vmem>>, vector<256x32xbf16>
    tpu.vector_store %arg6[%c0_5, %c0_6], %6 {strides = array<i32>} : memref<256x32xbf16, #tpu.memory_space<vmem>>, vector<256x32xbf16>,
    %8 = arith.truncf %5 : vector<256x32xf32> to vector<256x32xbf16>
    %c0_7 = arith.constant 0 : index
    %c0_8 = arith.constant 0 : index
    %9 = vector.load %arg4[%c0_7, %c0_8] : memref<32x96xbf16, #tpu.memory_space<vmem>>, vector<32x96xbf16>
    %cst_9 = arith.constant dense<0.000000e+00> : vector<256x96xf32>
    %10 = tpu.matmul %8, %9, %cst_9 {dimension_numbers = #tpu.dot_dimension_numbers<[1], [0], [0], [1], [0, 0, 1, 1], [], []>} : vector<256x32xbf16>, vector<32x96xbf16>, vector<256x96xf32> -> vector<256x96xf32>
    %c0_10 = arith.constant 0 : index
    %c0_11 = arith.constant 0 : index
    %11 = vector.load %arg5[%c0_10, %c0_11] : memref<1x96xf32, #tpu.memory_space<vmem>>, vector<1x96xf32>
    %12 = vector.broadcast %11 : vector<1x96xf32> to vector<256x96xf32>
    %13 = arith.addf %10, %12 : vector<256x96xf32>
    %14 = arith.truncf %13 : vector<256x96xf32> to vector<256x96xbf16>
    %c0_12 = arith.constant 0 : index
    %c0_13 = arith.constant 0 : index
    %15 = vector.load %arg7[%c0_12, %c0_13] : memref<256x96xbf16, #tpu.memory_space<vmem>>, vector<256x96xbf16>
    tpu.vector_store %arg7[%c0_12, %c0_13], %14 {strides = array<i32>} : memref<256x96xbf16, #tpu.memory_space<vmem>>, vector<256x96xbf16>,
    return
  }
  func.func @transform_0(%arg0: i32) -> (i32, i32) {
    %c0_i32 = arith.constant 0 : i32
    %c0_i32_0 = arith.constant 0 : i32
    return %arg0, %c0_i32 : i32, i32
  }
  func.func @transform_1(%arg0: i32) -> (i32, i32) {
    %c0_i32 = arith.constant 0 : i32
    %c0_i32_0 = arith.constant 0 : i32
    %c0_i32_1 = arith.constant 0 : i32
    return %c0_i32, %c0_i32_0 : i32, i32
  }
  func.func @transform_2(%arg0: i32) -> (i32, i32) {
    %c0_i32 = arith.constant 0 : i32
    %c0_i32_0 = arith.constant 0 : i32
    %c0_i32_1 = arith.constant 0 : i32
    return %c0_i32, %c0_i32_0 : i32, i32
  }
  func.func @transform_3(%arg0: i32) -> (i32, i32) {
    %c0_i32 = arith.constant 0 : i32
    %c0_i32_0 = arith.constant 0 : i32
    %c0_i32_1 = arith.constant 0 : i32
    return %c0_i32, %c0_i32_0 : i32, i32
  }
  func.func @transform_4(%arg0: i32) -> (i32, i32) {
    %c0_i32 = arith.constant 0 : i32
    %c0_i32_0 = arith.constant 0 : i32
    %c0_i32_1 = arith.constant 0 : i32
    return %c0_i32, %c0_i32_0 : i32, i32
  }
  func.func @transform_5(%arg0: i32) -> (i32, i32) {
    %c0_i32 = arith.constant 0 : i32
    %c0_i32_0 = arith.constant 0 : i32
    return %arg0, %c0_i32 : i32, i32
  }
  func.func @transform_6(%arg0: i32) -> (i32, i32) {
    %c0_i32 = arith.constant 0 : i32
    %c0_i32_0 = arith.constant 0 : i32
    return %arg0, %c0_i32 : i32, i32
  }
}

</mosaic_0001>

<bundles_post_ra>
// kernel: tpu_custom_call.1
= control target key start
LH: loop header
LB: loop body
LE: loop exit
PB: predicated region body
PF: predicated region fallthrough
CT: control target
= control target key end

     0   :  { %vm192_vm0 = vcmask 1041408   ;;  %vm143_vm1 = vcmask 31744   ;;  %vm485_vm2 = vcmask 257024   ;;  %vm541_vm3 = vcmask 261120   ;;  %s1678_s1 = inlined_call_operand.vmem [shape: bf16[4,32], index: 1, kind: input, shape index: {}]   ;;  %s1679_s0 = inlined_call_operand.vmem [shape: bf16[256,4], index: 0, kind: input, shape index: {}]   ;;  %s1680_s3 = inlined_call_operand.vmem [shape: bf16[32,96], index: 3, kind: input, shape index: {}]   ;;  %s1681_s2 = inlined_call_operand.vmem [shape: f32[1,32], index: 2, kind: input, shape index: {}]   ;;  %s1682_s5 = inlined_call_operand.vmem [shape: bf16[256,32], index: 5, kind: output, shape index: {0}]   ;;  %s1683_s4 = inlined_call_operand.vmem [shape: f32[1,96], index: 4, kind: input, shape index: {}]   ;;  %s1684_s6 = inlined_call_operand.vmem [shape: bf16[256,96], index: 6, kind: output, shape index: {1}]  }
   0x1   :  { %v55_v0 = vld [vmem:[%s1678_s1] sm:$0x3]  ;;  %v1207_v3 = vld [vmem:[%s1679_s0 + $0x8] sm:$0xff]   ;;  %v1208_v4 = vld [vmem:[%s1679_s0 + $0x10] sm:$0xff]   ;;  %vm879_vm4 = vcmask 781312  }
   0x2   :  { %1205 = vmatprep.subr.msk.bf16.mxu0 %vm192_vm0, %v55_v0  ;;  %v194_v1 = vsel %vm192_vm0, %v55_v0, 0  ;;  %v1206_v2 = vld [vmem:[%s1679_s0] sm:$0xff]   ;;  %v1209_v5 = vld [vmem:[%s1679_s0 + $0x18] sm:$0xff]   ;;  %v1211_v7 = vld [vmem:[%s1679_s0 + $0x28] sm:$0xff]  }
   0x3   :  { %1136 = vmatpush3.bf16.msra.mxu0 %v194_v1  ;;  %1137 = vmatprep.mubr.msk.bf16.mxu0 %vm143_vm1, %v1206_v2  ;;  %v1210_v6 = vld [vmem:[%s1679_s0 + $0x20] sm:$0xff]   ;;  %v1212_v8 = vld [vmem:[%s1679_s0 + $0x30] sm:$0xff]   ;;  %v1213_v9 = vld [vmem:[%s1679_s0 + $0x38] sm:$0xff]  }
   0x4   :  { %v1214_v10 = vld [vmem:[%s1679_s0 + $0x40] sm:$0xff]   ;;  %v1215_v11 = vld [vmem:[%s1679_s0 + $0x48] sm:$0xff]   ;;  %v1216_v12 = vld [vmem:[%s1679_s0 + $0x50] sm:$0xff]  }
   0x5   :  { %v1217_v13 = vld [vmem:[%s1679_s0 + $0x58] sm:$0xff]   ;;  %v1218_v14 = vld [vmem:[%s1679_s0 + $0x60] sm:$0xff]   ;;  %v1219_v15 = vld [vmem:[%s1679_s0 + $0x68] sm:$0xff]  }
   0x6   :  { %1138 = vmatmul.mubr.msk.bf16.vlgmr.msra.gmra.mxu0 %vm143_vm1, %v1207_v3  ;;  %v1220_v16 = vld [vmem:[%s1679_s0 + $0x70] sm:$0xff]   ;;  %v1221_v17 = vld [vmem:[%s1679_s0 + $0x78] sm:$0xff]   ;;  %v1222_v18 = vld [vmem:[%s1680_s3 + $0x8] sm:$0xff]  }
   0x7   :  { %1141 = vmatprep.mubr.msk.bf16.mxu0 %vm143_vm1, %v1208_v4  ;;  %1169 = vmatprep.subr.bf16.mxu1 %v1222_v18  ;;  %v1223_v19 = vld [vmem:[%s1680_s3] sm:$0xff]  }
   0x8   :  { %1170 = vmatpush3.bf16.msra.mxu1 %v1222_v18  ;;  %v1335_v20 = vld [vmem:[%s1681_s2] ss:$0 sm:$0xff] }
   0x9   :  { %1171 = vmatprep.subr.bf16.mxu1 %v1223_v19 }
   0xc   :  { %1172 = vmatpush3.bf16.msra.mxu1 %v1223_v19 }
   0xe   :  { %1142 = vmatmul.mubr.msk.bf16.gmra.mxu0 %vm143_vm1, %v1209_v5 }
   0xf   :  { %1145 = vmatprep.mubr.msk.bf16.mxu0 %vm143_vm1, %v1210_v6 }
  0x16   :  { %1146 = vmatmul.mubr.msk.bf16.gmra.mxu0 %vm143_vm1, %v1211_v7 }
  0x17   :  { %1149 = vmatprep.mubr.msk.bf16.mxu0 %vm143_vm1, %v1212_v8 }
  0x1e   :  { %1150 = vmatmul.mubr.msk.bf16.gmra.mxu0 %vm143_vm1, %v1213_v9 }
  0x1f   :  { %1153 = vmatprep.mubr.msk.bf16.mxu0 %vm143_vm1, %v1214_v10 }
  0x26   :  { %1154 = vmatmul.mubr.msk.bf16.gmra.mxu0 %vm143_vm1, %v1215_v11 }
  0x27   :  { %1157 = vmatprep.mubr.msk.bf16.mxu0 %vm143_vm1, %v1216_v12 }
  0x2e   :  { %1158 = vmatmul.mubr.msk.bf16.gmra.mxu0 %vm143_vm1, %v1217_v13 }
  0x2f   :  { %1161 = vmatprep.mubr.msk.bf16.mxu0 %vm143_vm1, %v1218_v14 }
  0x36   :  { %1162 = vmatmul.mubr.msk.bf16.gmra.mxu0 %vm143_vm1, %v1219_v15 }
  0x37   :  { %1165 = vmatprep.mubr.msk.bf16.mxu0 %vm143_vm1, %v1220_v16 }
  0x3e   :  { %1166 = vmatmul.mubr.msk.bf16.gmra.mxu0 %vm143_vm1, %v1221_v17 }
  0xc6   :  { %v1139_v21 = vpop.f32.mrf.mxu0 }
  0xc7   :  { %v239_v22 = vadd.f32 %v1139_v21, %v1335_v20 }
  0xc8   :  { %v230_v23 = vpop.f32.mrf.mxu0 }
  0xc9   :  { %v1038_v24 = vpack.c.bf16 %v239_v22, %v239_v22  ;;  %v231_v25 = vadd.f32 %v1335_v20, %v230_v23 }
  0xca   :  { %v1140_v26 = vpop.f32.mrf.mxu0 }
  0xcb   :  { %488 = vst.msk [vmem:[%s1682_s5 + $0x8] sm:$0xf] %vm485_vm2, %v1038_v24  ;;  %v1036_v27 = vpack.c.bf16 %v231_v25, %v231_v25  ;;  %v242_v28 = vadd.f32 %v1140_v26, %v1335_v20 }
  0xcc   :  { %v233_v29 = vpop.f32.mrf.mxu0 }
  0xcd   :  { %486 = vst.msk [vmem:[%s1682_s5] sm:$0xf] %vm485_vm2, %v1036_v27  ;;  %v1039_v30 = vpack.c.bf16 %v242_v28, %v242_v28  ;;  %v234_v31 = vadd.f32 %v1335_v20, %v233_v29  ;;  %v358_v36 = vpack.c.bf16 %v242_v28, %v239_v22 }
  0xce   :  { %v1143_v32 = vpop.f32.mrf.mxu0 }
  0xcf   :  { %489 = vst.msk [vmem:[%s1682_s5 + $0xc] sm:$0xf] %vm485_vm2, %v1039_v30  ;;  %v1037_v33 = vpack.c.bf16 %v234_v31, %v234_v31  ;;  %v255_v34 = vadd.f32 %v1143_v32, %v1335_v20  ;;  %v357_v35 = vpack.c.bf16 %v234_v31, %v231_v25 }
  0xd0   :  { %v246_v37 = vpop.f32.mrf.mxu0 }
  0xd1   :  { %487 = vst.msk [vmem:[%s1682_s5 + $0x4] sm:$0xf] %vm485_vm2, %v1037_v33  ;;  %v1042_v38 = vpack.c.bf16 %v255_v34, %v255_v34  ;;  %v247_v39 = vadd.f32 %v1335_v20, %v246_v37  ;;  %1173 = vmatprep.mubr.msk.bf16.mxu1 %vm541_vm3, %v357_v35 }
  0xd2   :  { %v1144_v40 = vpop.f32.mrf.mxu0  ;;  %1174 = vmatmul.mubr.msk.bf16.vlgmr.msra.gmra.mxu1 %vm541_vm3, %v358_v36 }
  0xd3   :  { %492 = vst.msk [vmem:[%s1682_s5 + $0x18] sm:$0xf] %vm485_vm2, %v1042_v38  ;;  %v1040_v41 = vpack.c.bf16 %v247_v39, %v247_v39  ;;  %v258_v42 = vadd.f32 %v1144_v40, %v1335_v20 }
  0xd4   :  { %v249_v43 = vpop.f32.mrf.mxu0 }
  0xd5   :  { %490 = vst.msk [vmem:[%s1682_s5 + $0x10] sm:$0xf] %vm485_vm2, %v1040_v41  ;;  %v1043_v44 = vpack.c.bf16 %v258_v42, %v258_v42  ;;  %v250_v45 = vadd.f32 %v1335_v20, %v249_v43  ;;  %v360_v50 = vpack.c.bf16 %v258_v42, %v255_v34 }
  0xd6   :  { %v1147_v46 = vpop.f32.mrf.mxu0 }
  0xd7   :  { %493 = vst.msk [vmem:[%s1682_s5 + $0x1c] sm:$0xf] %vm485_vm2, %v1043_v44  ;;  %v359_v47 = vpack.c.bf16 %v250_v45, %v247_v39  ;;  %v1041_v48 = vpack.c.bf16 %v250_v45, %v250_v45  ;;  %v271_v49 = vadd.f32 %v1147_v46, %v1335_v20 }
  0xd8   :  { %v262_v51 = vpop.f32.mrf.mxu0 }
  0xd9   :  { %491 = vst.msk [vmem:[%s1682_s5 + $0x14] sm:$0xf] %vm485_vm2, %v1041_v48  ;;  %v1046_v52 = vpack.c.bf16 %v271_v49, %v271_v49  ;;  %v263_v53 = vadd.f32 %v1335_v20, %v262_v51  ;;  %1177 = vmatprep.mubr.msk.bf16.mxu1 %vm541_vm3, %v359_v47 }
  0xda   :  { %v1148_v54 = vpop.f32.mrf.mxu0  ;;  %1178 = vmatmul.mubr.msk.bf16.gmra.mxu1 %vm541_vm3, %v360_v50 }
  0xdb   :  { %496 = vst.msk [vmem:[%s1682_s5 + $0x28] sm:$0xf] %vm485_vm2, %v1046_v52  ;;  %v1044_v55 = vpack.c.bf16 %v263_v53, %v263_v53  ;;  %v274_v56 = vadd.f32 %v1148_v54, %v1335_v20 }
  0xdc   :  { %v265_v57 = vpop.f32.mrf.mxu0 }
  0xdd   :  { %494 = vst.msk [vmem:[%s1682_s5 + $0x20] sm:$0xf] %vm485_vm2, %v1044_v55  ;;  %v1047_v58 = vpack.c.bf16 %v274_v56, %v274_v56  ;;  %v266_v59 = vadd.f32 %v1335_v20, %v265_v57  ;;  %v362_v0 = vpack.c.bf16 %v274_v56, %v271_v49 }
  0xde   :  { %v1151_v60 = vpop.f32.mrf.mxu0 }
  0xdf   :  { %497 = vst.msk [vmem:[%s1682_s5 + $0x2c] sm:$0xf] %vm485_vm2, %v1047_v58  ;;  %v361_v61 = vpack.c.bf16 %v266_v59, %v263_v53  ;;  %v1045_v62 = vpack.c.bf16 %v266_v59, %v266_v59  ;;  %v287_v63 = vadd.f32 %v1151_v60, %v1335_v20 }
  0xe0   :  { %v278_v1 = vpop.f32.mrf.mxu0 }
  0xe1   :  { %495 = vst.msk [vmem:[%s1682_s5 + $0x24] sm:$0xf] %vm485_vm2, %v1045_v62  ;;  %v1050_v2 = vpack.c.bf16 %v287_v63, %v287_v63  ;;  %v279_v3 = vadd.f32 %v1335_v20, %v278_v1  ;;  %1181 = vmatprep.mubr.msk.bf16.mxu1 %vm541_vm3, %v361_v61 }
  0xe2   :  { %v1152_v4 = vpop.f32.mrf.mxu0  ;;  %1182 = vmatmul.mubr.msk.bf16.gmra.mxu1 %vm541_vm3, %v362_v0 }
  0xe3   :  { %500 = vst.msk [vmem:[%s1682_s5 + $0x38] sm:$0xf] %vm485_vm2, %v1050_v2  ;;  %v1048_v5 = vpack.c.bf16 %v279_v3, %v279_v3  ;;  %v290_v6 = vadd.f32 %v1152_v4, %v1335_v20 }
  0xe4   :  { %v281_v7 = vpop.f32.mrf.mxu0 }
  0xe5   :  { %498 = vst.msk [vmem:[%s1682_s5 + $0x30] sm:$0xf] %vm485_vm2, %v1048_v5  ;;  %v1051_v8 = vpack.c.bf16 %v290_v6, %v290_v6  ;;  %v282_v9 = vadd.f32 %v1335_v20, %v281_v7  ;;  %v364_v14 = vpack.c.bf16 %v290_v6, %v287_v63 }
  0xe6   :  { %v1155_v10 = vpop.f32.mrf.mxu0 }
  0xe7   :  { %501 = vst.msk [vmem:[%s1682_s5 + $0x3c] sm:$0xf] %vm485_vm2, %v1051_v8  ;;  %v363_v11 = vpack.c.bf16 %v282_v9, %v279_v3  ;;  %v1049_v12 = vpack.c.bf16 %v282_v9, %v282_v9  ;;  %v303_v13 = vadd.f32 %v1155_v10, %v1335_v20 }
  0xe8   :  { %v294_v15 = vpop.f32.mrf.mxu0 }
  0xe9   :  { %499 = vst.msk [vmem:[%s1682_s5 + $0x34] sm:$0xf] %vm485_vm2, %v1049_v12  ;;  %v1054_v16 = vpack.c.bf16 %v303_v13, %v303_v13  ;;  %v295_v17 = vadd.f32 %v1335_v20, %v294_v15  ;;  %1185 = vmatprep.mubr.msk.bf16.mxu1 %vm541_vm3, %v363_v11 }
  0xea   :  { %v1156_v18 = vpop.f32.mrf.mxu0  ;;  %1186 = vmatmul.mubr.msk.bf16.gmra.mxu1 %vm541_vm3, %v364_v14 }
  0xeb   :  { %504 = vst.msk [vmem:[%s1682_s5 + $0x48] sm:$0xf] %vm485_vm2, %v1054_v16  ;;  %v1052_v19 = vpack.c.bf16 %v295_v17, %v295_v17  ;;  %v306_v21 = vadd.f32 %v1156_v18, %v1335_v20 }
  0xec   :  { %v297_v22 = vpop.f32.mrf.mxu0 }
  0xed   :  { %502 = vst.msk [vmem:[%s1682_s5 + $0x40] sm:$0xf] %vm485_vm2, %v1052_v19  ;;  %v1055_v23 = vpack.c.bf16 %v306_v21, %v306_v21  ;;  %v298_v24 = vadd.f32 %v1335_v20, %v297_v22  ;;  %v366_v29 = vpack.c.bf16 %v306_v21, %v303_v13 }
  0xee   :  { %v1159_v25 = vpop.f32.mrf.mxu0 }
  0xef   :  { %505 = vst.msk [vmem:[%s1682_s5 + $0x4c] sm:$0xf] %vm485_vm2, %v1055_v23  ;;  %v365_v26 = vpack.c.bf16 %v298_v24, %v295_v17  ;;  %v1053_v27 = vpack.c.bf16 %v298_v24, %v298_v24  ;;  %v319_v28 = vadd.f32 %v1159_v25, %v1335_v20 }
  0xf0   :  { %v310_v30 = vpop.f32.mrf.mxu0 }
  0xf1   :  { %503 = vst.msk [vmem:[%s1682_s5 + $0x44] sm:$0xf] %vm485_vm2, %v1053_v27  ;;  %v1058_v31 = vpack.c.bf16 %v319_v28, %v319_v28  ;;  %v311_v32 = vadd.f32 %v1335_v20, %v310_v30  ;;  %1189 = vmatprep.mubr.msk.bf16.mxu1 %vm541_vm3, %v365_v26 }
  0xf2   :  { %v1160_v33 = vpop.f32.mrf.mxu0  ;;  %1190 = vmatmul.mubr.msk.bf16.gmra.mxu1 %vm541_vm3, %v366_v29 }
  0xf3   :  { %508 = vst.msk [vmem:[%s1682_s5 + $0x58] sm:$0xf] %vm485_vm2, %v1058_v31  ;;  %v1056_v34 = vpack.c.bf16 %v311_v32, %v311_v32  ;;  %v322_v35 = vadd.f32 %v1160_v33, %v1335_v20 }
  0xf4   :  { %v313_v36 = vpop.f32.mrf.mxu0 }
  0xf5   :  { %506 = vst.msk [vmem:[%s1682_s5 + $0x50] sm:$0xf] %vm485_vm2, %v1056_v34  ;;  %v1059_v37 = vpack.c.bf16 %v322_v35, %v322_v35  ;;  %v314_v38 = vadd.f32 %v1335_v20, %v313_v36  ;;  %v368_v43 = vpack.c.bf16 %v322_v35, %v319_v28 }
  0xf6   :  { %v1163_v39 = vpop.f32.mrf.mxu0 }
  0xf7   :  { %509 = vst.msk [vmem:[%s1682_s5 + $0x5c] sm:$0xf] %vm485_vm2, %v1059_v37  ;;  %v367_v40 = vpack.c.bf16 %v314_v38, %v311_v32  ;;  %v1057_v41 = vpack.c.bf16 %v314_v38, %v314_v38  ;;  %v335_v42 = vadd.f32 %v1163_v39, %v1335_v20 }
  0xf8   :  { %v326_v44 = vpop.f32.mrf.mxu0 }
  0xf9   :  { %507 = vst.msk [vmem:[%s1682_s5 + $0x54] sm:$0xf] %vm485_vm2, %v1057_v41  ;;  %v1062_v45 = vpack.c.bf16 %v335_v42, %v335_v42  ;;  %v327_v46 = vadd.f32 %v1335_v20, %v326_v44  ;;  %1193 = vmatprep.mubr.msk.bf16.mxu1 %vm541_vm3, %v367_v40 }
  0xfa   :  { %v1164_v47 = vpop.f32.mrf.mxu0  ;;  %1194 = vmatmul.mubr.msk.bf16.gmra.mxu1 %vm541_vm3, %v368_v43 }
  0xfb   :  { %512 = vst.msk [vmem:[%s1682_s5 + $0x68] sm:$0xf] %vm485_vm2, %v1062_v45  ;;  %v1060_v48 = vpack.c.bf16 %v327_v46, %v327_v46  ;;  %v338_v49 = vadd.f32 %v1164_v47, %v1335_v20 }
  0xfc   :  { %v329_v50 = vpop.f32.mrf.mxu0 }
  0xfd   :  { %510 = vst.msk [vmem:[%s1682_s5 + $0x60] sm:$0xf] %vm485_vm2, %v1060_v48  ;;  %v1063_v51 = vpack.c.bf16 %v338_v49, %v338_v49  ;;  %v330_v52 = vadd.f32 %v1335_v20, %v329_v50  ;;  %v370_v57 = vpack.c.bf16 %v338_v49, %v335_v42 }
  0xfe   :  { %v1167_v53 = vpop.f32.mrf.mxu0 }
  0xff   :  { %513 = vst.msk [vmem:[%s1682_s5 + $0x6c] sm:$0xf] %vm485_vm2, %v1063_v51  ;;  %v369_v54 = vpack.c.bf16 %v330_v52, %v327_v46  ;;  %v1061_v55 = vpack.c.bf16 %v330_v52, %v330_v52  ;;  %v351_v56 = vadd.f32 %v1167_v53, %v1335_v20 }
 0x100   :  { %v342_v58 = vpop.f32.mrf.mxu0 }
 0x101   :  { %511 = vst.msk [vmem:[%s1682_s5 + $0x64] sm:$0xf] %vm485_vm2, %v1061_v55  ;;  %v1066_v59 = vpack.c.bf16 %v351_v56, %v351_v56  ;;  %v343_v60 = vadd.f32 %v1335_v20, %v342_v58  ;;  %1197 = vmatprep.mubr.msk.bf16.mxu1 %vm541_vm3, %v369_v54 }
 0x102   :  { %v1168_v61 = vpop.f32.mrf.mxu0  ;;  %1198 = vmatmul.mubr.msk.bf16.gmra.mxu1 %vm541_vm3, %v370_v57 }
 0x103   :  { %516 = vst.msk [vmem:[%s1682_s5 + $0x78] sm:$0xf] %vm485_vm2, %v1066_v59  ;;  %v1064_v62 = vpack.c.bf16 %v343_v60, %v343_v60  ;;  %v354_v63 = vadd.f32 %v1168_v61, %v1335_v20 }
 0x104   :  { %v345_v0 = vpop.f32.mrf.mxu0 }
 0x105   :  { %514 = vst.msk [vmem:[%s1682_s5 + $0x70] sm:$0xf] %vm485_vm2, %v1064_v62  ;;  %v1067_v1 = vpack.c.bf16 %v354_v63, %v354_v63  ;;  %v346_v2 = vadd.f32 %v1335_v20, %v345_v0  ;;  %v372_v5 = vpack.c.bf16 %v354_v63, %v351_v56  ;;  %v1516_v20 = vld [vmem:[%s1683_s4] ss:$0 sm:$0xff] }
 0x107   :  { %517 = vst.msk [vmem:[%s1682_s5 + $0x7c] sm:$0xf] %vm485_vm2, %v1067_v1  ;;  %v371_v3 = vpack.c.bf16 %v346_v2, %v343_v60  ;;  %v1065_v4 = vpack.c.bf16 %v346_v2, %v346_v2 }
 0x109   :  { %515 = vst.msk [vmem:[%s1682_s5 + $0x74] sm:$0xf] %vm485_vm2, %v1065_v4  ;;  %1201 = vmatprep.mubr.msk.bf16.mxu1 %vm541_vm3, %v371_v3 }
 0x10a   :  { %1202 = vmatmul.mubr.msk.bf16.gmra.mxu1 %vm541_vm3, %v372_v5 }
 0x192   :  { %v1175_v6 = vpop.f32.mrf.mxu1 }
 0x193   :  { %v633_v7 = vadd.f32 %v1175_v6, %v1516_v20 }
 0x194   :  { %v624_v8 = vpop.f32.mrf.mxu1 }
 0x195   :  { %v1070_v9 = vpack.c.bf16 %v633_v7, %v633_v7  ;;  %v625_v10 = vadd.f32 %v1516_v20, %v624_v8 }
 0x196   :  { %v1176_v11 = vpop.f32.mrf.mxu1 }
 0x197   :  { %882 = vst.msk [vmem:[%s1684_s6 + $0x8] sm:$0xf] %vm879_vm4, %v1070_v9  ;;  %v1068_v12 = vpack.c.bf16 %v625_v10, %v625_v10  ;;  %v636_v13 = vadd.f32 %v1176_v11, %v1516_v20 }
 0x198   :  { %v627_v14 = vpop.f32.mrf.mxu1 }
 0x199   :  { %880 = vst.msk [vmem:[%s1684_s6] sm:$0xf] %vm879_vm4, %v1068_v12  ;;  %v1071_v15 = vpack.c.bf16 %v636_v13, %v636_v13  ;;  %v628_v16 = vadd.f32 %v1516_v20, %v627_v14 }
 0x19a   :  { %v1179_v17 = vpop.f32.mrf.mxu1 }
 0x19b   :  { %883 = vst.msk [vmem:[%s1684_s6 + $0xc] sm:$0xf] %vm879_vm4, %v1071_v15  ;;  %v1069_v18 = vpack.c.bf16 %v628_v16, %v628_v16  ;;  %v649_v19 = vadd.f32 %v1179_v17, %v1516_v20 }
 0x19c   :  { %v640_v21 = vpop.f32.mrf.mxu1 }
 0x19d   :  { %881 = vst.msk [vmem:[%s1684_s6 + $0x4] sm:$0xf] %vm879_vm4, %v1069_v18  ;;  %v1074_v22 = vpack.c.bf16 %v649_v19, %v649_v19  ;;  %v641_v23 = vadd.f32 %v1516_v20, %v640_v21 }
 0x19e   :  { %v1180_v24 = vpop.f32.mrf.mxu1 }
 0x19f   :  { %886 = vst.msk [vmem:[%s1684_s6 + $0x18] sm:$0xf] %vm879_vm4, %v1074_v22  ;;  %v1072_v25 = vpack.c.bf16 %v641_v23, %v641_v23  ;;  %v652_v26 = vadd.f32 %v1180_v24, %v1516_v20 }
 0x1a0   :  { %v643_v27 = vpop.f32.mrf.mxu1 }
 0x1a1   :  { %884 = vst.msk [vmem:[%s1684_s6 + $0x10] sm:$0xf] %vm879_vm4, %v1072_v25  ;;  %v1075_v28 = vpack.c.bf16 %v652_v26, %v652_v26  ;;  %v644_v29 = vadd.f32 %v1516_v20, %v643_v27 }
 0x1a2   :  { %v1183_v30 = vpop.f32.mrf.mxu1 }
 0x1a3   :  { %887 = vst.msk [vmem:[%s1684_s6 + $0x1c] sm:$0xf] %vm879_vm4, %v1075_v28  ;;  %v1073_v31 = vpack.c.bf16 %v644_v29, %v644_v29  ;;  %v665_v32 = vadd.f32 %v1183_v30, %v1516_v20 }
 0x1a4   :  { %v656_v33 = vpop.f32.mrf.mxu1 }
 0x1a5   :  { %885 = vst.msk [vmem:[%s1684_s6 + $0x14] sm:$0xf] %vm879_vm4, %v1073_v31  ;;  %v1078_v34 = vpack.c.bf16 %v665_v32, %v665_v32  ;;  %v657_v35 = vadd.f32 %v1516_v20, %v656_v33 }
 0x1a6   :  { %v1184_v36 = vpop.f32.mrf.mxu1 }
 0x1a7   :  { %890 = vst.msk [vmem:[%s1684_s6 + $0x28] sm:$0xf] %vm879_vm4, %v1078_v34  ;;  %v1076_v37 = vpack.c.bf16 %v657_v35, %v657_v35  ;;  %v668_v38 = vadd.f32 %v1184_v36, %v1516_v20 }
 0x1a8   :  { %v659_v39 = vpop.f32.mrf.mxu1 }
 0x1a9   :  { %888 = vst.msk [vmem:[%s1684_s6 + $0x20] sm:$0xf] %vm879_vm4, %v1076_v37  ;;  %v1079_v40 = vpack.c.bf16 %v668_v38, %v668_v38  ;;  %v660_v41 = vadd.f32 %v1516_v20, %v659_v39 }
 0x1aa   :  { %v1187_v42 = vpop.f32.mrf.mxu1 }
 0x1ab   :  { %891 = vst.msk [vmem:[%s1684_s6 + $0x2c] sm:$0xf] %vm879_vm4, %v1079_v40  ;;  %v1077_v43 = vpack.c.bf16 %v660_v41, %v660_v41  ;;  %v681_v44 = vadd.f32 %v1187_v42, %v1516_v20 }
 0x1ac   :  { %v672_v45 = vpop.f32.mrf.mxu1 }
 0x1ad   :  { %889 = vst.msk [vmem:[%s1684_s6 + $0x24] sm:$0xf] %vm879_vm4, %v1077_v43  ;;  %v1082_v46 = vpack.c.bf16 %v681_v44, %v681_v44  ;;  %v673_v47 = vadd.f32 %v1516_v20, %v672_v45 }
 0x1ae   :  { %v1188_v48 = vpop.f32.mrf.mxu1 }
 0x1af   :  { %894 = vst.msk [vmem:[%s1684_s6 + $0x38] sm:$0xf] %vm879_vm4, %v1082_v46  ;;  %v1080_v49 = vpack.c.bf16 %v673_v47, %v673_v47  ;;  %v684_v50 = vadd.f32 %v1188_v48, %v1516_v20 }
 0x1b0   :  { %v675_v51 = vpop.f32.mrf.mxu1 }
 0x1b1   :  { %892 = vst.msk [vmem:[%s1684_s6 + $0x30] sm:$0xf] %vm879_vm4, %v1080_v49  ;;  %v1083_v52 = vpack.c.bf16 %v684_v50, %v684_v50  ;;  %v676_v53 = vadd.f32 %v1516_v20, %v675_v51 }
 0x1b2   :  { %v1191_v54 = vpop.f32.mrf.mxu1 }
 0x1b3   :  { %895 = vst.msk [vmem:[%s1684_s6 + $0x3c] sm:$0xf] %vm879_vm4, %v1083_v52  ;;  %v1081_v55 = vpack.c.bf16 %v676_v53, %v676_v53  ;;  %v697_v56 = vadd.f32 %v1191_v54, %v1516_v20 }
 0x1b4   :  { %v688_v57 = vpop.f32.mrf.mxu1 }
 0x1b5   :  { %893 = vst.msk [vmem:[%s1684_s6 + $0x34] sm:$0xf] %vm879_vm4, %v1081_v55  ;;  %v1086_v58 = vpack.c.bf16 %v697_v56, %v697_v56  ;;  %v689_v59 = vadd.f32 %v1516_v20, %v688_v57 }
 0x1b6   :  { %v1192_v60 = vpop.f32.mrf.mxu1 }
 0x1b7   :  { %898 = vst.msk [vmem:[%s1684_s6 + $0x48] sm:$0xf] %vm879_vm4, %v1086_v58  ;;  %v1084_v61 = vpack.c.bf16 %v689_v59, %v689_v59  ;;  %v700_v62 = vadd.f32 %v1192_v60, %v1516_v20 }
 0x1b8   :  { %v691_v63 = vpop.f32.mrf.mxu1 }
 0x1b9   :  { %896 = vst.msk [vmem:[%s1684_s6 + $0x40] sm:$0xf] %vm879_vm4, %v1084_v61  ;;  %v1087_v0 = vpack.c.bf16 %v700_v62, %v700_v62  ;;  %v692_v1 = vadd.f32 %v1516_v20, %v691_v63 }
 0x1ba   :  { %v1195_v2 = vpop.f32.mrf.mxu1 }
 0x1bb   :  { %899 = vst.msk [vmem:[%s1684_s6 + $0x4c] sm:$0xf] %vm879_vm4, %v1087_v0  ;;  %v1085_v3 = vpack.c.bf16 %v692_v1, %v692_v1  ;;  %v713_v4 = vadd.f32 %v1195_v2, %v1516_v20 }
 0x1bc   :  { %v704_v5 = vpop.f32.mrf.mxu1 }
 0x1bd   :  { %897 = vst.msk [vmem:[%s1684_s6 + $0x44] sm:$0xf] %vm879_vm4, %v1085_v3  ;;  %v1090_v6 = vpack.c.bf16 %v713_v4, %v713_v4  ;;  %v705_v7 = vadd.f32 %v1516_v20, %v704_v5 }
 0x1be   :  { %v1196_v8 = vpop.f32.mrf.mxu1 }
 0x1bf   :  { %902 = vst.msk [vmem:[%s1684_s6 + $0x58] sm:$0xf] %vm879_vm4, %v1090_v6  ;;  %v1088_v9 = vpack.c.bf16 %v705_v7, %v705_v7  ;;  %v716_v10 = vadd.f32 %v1196_v8, %v1516_v20 }
 0x1c0   :  { %v707_v11 = vpop.f32.mrf.mxu1 }
 0x1c1   :  { %900 = vst.msk [vmem:[%s1684_s6 + $0x50] sm:$0xf] %vm879_vm4, %v1088_v9  ;;  %v1091_v12 = vpack.c.bf16 %v716_v10, %v716_v10  ;;  %v708_v13 = vadd.f32 %v1516_v20, %v707_v11 }
 0x1c2   :  { %v1199_v14 = vpop.f32.mrf.mxu1 }
 0x1c3   :  { %903 = vst.msk [vmem:[%s1684_s6 + $0x5c] sm:$0xf] %vm879_vm4, %v1091_v12  ;;  %v1089_v15 = vpack.c.bf16 %v708_v13, %v708_v13  ;;  %v729_v16 = vadd.f32 %v1199_v14, %v1516_v20 }
 0x1c4   :  { %v720_v17 = vpop.f32.mrf.mxu1 }
 0x1c5   :  { %901 = vst.msk [vmem:[%s1684_s6 + $0x54] sm:$0xf] %vm879_vm4, %v1089_v15  ;;  %v1094_v18 = vpack.c.bf16 %v729_v16, %v729_v16  ;;  %v721_v19 = vadd.f32 %v1516_v20, %v720_v17 }
 0x1c6   :  { %v1200_v21 = vpop.f32.mrf.mxu1 }
 0x1c7   :  { %906 = vst.msk [vmem:[%s1684_s6 + $0x68] sm:$0xf] %vm879_vm4, %v1094_v18  ;;  %v1092_v22 = vpack.c.bf16 %v721_v19, %v721_v19  ;;  %v732_v23 = vadd.f32 %v1200_v21, %v1516_v20 }
 0x1c8   :  { %v723_v24 = vpop.f32.mrf.mxu1 }
 0x1c9   :  { %904 = vst.msk [vmem:[%s1684_s6 + $0x60] sm:$0xf] %vm879_vm4, %v1092_v22  ;;  %v1095_v25 = vpack.c.bf16 %v732_v23, %v732_v23  ;;  %v724_v26 = vadd.f32 %v1516_v20, %v723_v24 }
 0x1ca   :  { %v1203_v27 = vpop.f32.mrf.mxu1 }
 0x1cb   :  { %907 = vst.msk [vmem:[%s1684_s6 + $0x6c] sm:$0xf] %vm879_vm4, %v1095_v25  ;;  %v1093_v28 = vpack.c.bf16 %v724_v26, %v724_v26  ;;  %v745_v29 = vadd.f32 %v1203_v27, %v1516_v20 }
 0x1cc   :  { %v736_v30 = vpop.f32.mrf.mxu1 }
 0x1cd   :  { %905 = vst.msk [vmem:[%s1684_s6 + $0x64] sm:$0xf] %vm879_vm4, %v1093_v28  ;;  %v1098_v31 = vpack.c.bf16 %v745_v29, %v745_v29  ;;  %v737_v32 = vadd.f32 %v1516_v20, %v736_v30 }
 0x1ce   :  { %v1204_v33 = vpop.f32.mrf.mxu1 }
 0x1cf   :  { %910 = vst.msk [vmem:[%s1684_s6 + $0x78] sm:$0xf] %vm879_vm4, %v1098_v31  ;;  %v1096_v34 = vpack.c.bf16 %v737_v32, %v737_v32  ;;  %v748_v35 = vadd.f32 %v1204_v33, %v1516_v20 }
 0x1d0   :  { %v739_v36 = vpop.f32.mrf.mxu1 }
 0x1d1   :  { %908 = vst.msk [vmem:[%s1684_s6 + $0x70] sm:$0xf] %vm879_vm4, %v1096_v34  ;;  %v1099_v37 = vpack.c.bf16 %v748_v35, %v748_v35  ;;  %v740_v38 = vadd.f32 %v1516_v20, %v739_v36 }
 0x1d3   :  { %911 = vst.msk [vmem:[%s1684_s6 + $0x7c] sm:$0xf] %vm879_vm4, %v1099_v37  ;;  %v1097_v39 = vpack.c.bf16 %v740_v38, %v740_v38 }
 0x1d5   :  { %909 = vst.msk [vmem:[%s1684_s6 + $0x74] sm:$0xf] %vm879_vm4, %v1097_v39 }

</bundles_post_ra>
